<compile_context>
chip_gen: v7x
topology: tpu7x:2x2x1
jax: 0.10.0
libtpu: 0.0.40
codegen_flags: <defaults>
</compile_context>

<pallas_src>
import jax
import jax.numpy as jnp
from jax import lax
from jax.experimental import pallas as pl
from jax.experimental.pallas import tpu as pltpu


L_BLOCK = 128                 # intra-block length -> lane width / MXU-native tile
MAX_BLOCKS_PER_CHUNK = 1024   # blocks (sublane rows) processed per grid step


def _round_up(x, m):
    return ((x + m - 1) // m) * m


# ----------------------------------------------------------------------------
# Pallas kernel: one (batch, chunk-of-blocks) grid step — pure matmul + rank-2
# boundary correction, single store, no serial state (fully parallel grid).
# ----------------------------------------------------------------------------
def lowshelf_block_kernel(x_ref, z_ref, ft_ref, h_ref, y_ref):
    # x_ref : (NBc, L)  chunk of NBc length-L signal blocks (this batch)
    # z_ref : (NBc, 2)  precomputed incoming state of every block
    # ft_ref: (L, L)    F^T  (zero-state intra-block response, transposed)
    # h_ref : (2, L)    boundary-correction rows (A^m)[0, :]
    # y_ref : (NBc, L)  output chunk
    y0 = jnp.dot(x_ref[...], ft_ref[...], preferred_element_type=jnp.float32)
    z = z_ref[...]
    y_ref[...] = (y0
                  + z[:, 0:1] * h_ref[0:1, :]
                  + z[:, 1:2] * h_ref[1:2, :])


def _pallas_block_apply(x_blocks, z_blocks, ft, hmat, nbc):
    """x_blocks: (bs, nbp, L), z_blocks: (bs, nbp, 2), ft: (bs, L, L), hmat: (bs, 2, L)."""
    bsz, nbp, l = x_blocks.shape
    nchunks = nbp // nbc
    return pl.pallas_call(
        lowshelf_block_kernel,
        out_shape=jax.ShapeDtypeStruct((bsz, nbp, l), jnp.float32),
        grid=(bsz, nchunks),
        in_specs=[
            pl.BlockSpec((None, nbc, l), lambda b, c: (b, c, 0)),
            pl.BlockSpec((None, nbc, 2), lambda b, c: (b, c, 0)),
            pl.BlockSpec((None, l, l), lambda b, c: (b, 0, 0)),
            pl.BlockSpec((None, 2, l), lambda b, c: (b, 0, 0)),
        ],
        out_specs=pl.BlockSpec((None, nbc, l), lambda b, c: (b, c, 0)),
        compiler_params=pltpu.CompilerParams(
            dimension_semantics=("parallel", "parallel"),
        ),
    )(x_blocks, z_blocks, ft, hmat)


# ----------------------------------------------------------------------------
# Plain-JAX glue: parameter denormalization, biquad coefficients, block matrices,
# per-block tail states and the log-depth inter-block state scan.
# ----------------------------------------------------------------------------
def _denormalize(p, lo, hi):
    return p * (hi - lo) + lo


def _biquad_low_shelf(gain_db, cutoff_freq, q_factor, sample_rate):
    """All inputs shape (bs,). Returns b, a each (bs, 3), normalized by a0."""
    A = 10.0 ** (gain_db / 40.0)
    w0 = 2.0 * jnp.pi * (cutoff_freq / sample_rate)
    alpha = jnp.sin(w0) / (2.0 * q_factor)
    cos_w0 = jnp.cos(w0)
    sqrt_A = jnp.sqrt(A)

    b0 = A * ((A + 1) - (A - 1) * cos_w0 + 2 * sqrt_A * alpha)
    b1 = 2 * A * ((A - 1) - (A + 1) * cos_w0)
    b2 = A * ((A + 1) - (A - 1) * cos_w0 - 2 * sqrt_A * alpha)
    a0 = (A + 1) + (A - 1) * cos_w0 + 2 * sqrt_A * alpha
    a1 = -2 * ((A - 1) + (A + 1) * cos_w0)
    a2 = (A + 1) + (A - 1) * cos_w0 - 2 * sqrt_A * alpha

    b = jnp.stack([b0, b1, b2], axis=1) / a0[:, None]
    a = jnp.stack([a0, a1, a2], axis=1) / a0[:, None]
    return b, a


def _block_filter_matrices(b, a, l=L_BLOCK):
    """b, a: (bs, 3) biquad coeffs normalized by a0.

    Returns:
      ft   (bs, l, l): F^T, zero-state intra-block response (upper-tri Toeplitz).
      hmat (bs, 2, l): boundary-correction rows (A^m)[0, :].
      gT   (bs, l, 2): tail-state map, w = x_blk @ gT.
      M    (bs, 2, 2): A^l, inter-block state transition.
    """
    b0, b1, b2 = b[:, 0], b[:, 1], b[:, 2]
    a1, a2 = a[:, 1], a[:, 2]
    bs = b.shape[0]

    # DF2T state-space:  s[n] = A s[n-1] + Bv x[n],  y[n] = b0 x[n] + [1,0] s[n-1]
    A = jnp.stack(
        [jnp.stack([-a1, jnp.ones_like(a1)], axis=-1),
         jnp.stack([-a2, jnp.zeros_like(a2)], axis=-1)], axis=-2)      # (bs, 2, 2)
    Bv = jnp.stack([b1 - a1 * b0, b2 - a2 * b0], axis=-1)              # (bs, 2)

    # Powers A^0 .. A^{l-1} and A^l via log-doubling (7 steps for l=128).
    P = jnp.broadcast_to(jnp.eye(2, dtype=jnp.float32)[None, None], (bs, 1, 2, 2))
    An = A
    n = 1
    while n < l:
        P = jnp.concatenate([P, jnp.einsum('bij,bnjk->bnik', An, P)], axis=1)
        An = jnp.einsum('bij,bjk->bik', An, An)
        n *= 2
    # P[:, p] = A^p (p = 0..l-1),  An = A^l

    rows = P[:, :, 0, :]                                               # (bs, l, 2) = (A^p)[0,:]

    # impulse response: h[0] = b0, h[m] = (A^{m-1})[0,:] @ Bv
    h_tail = jnp.einsum('bpi,bi->bp', rows[:, :l - 1, :], Bv)          # (bs, l-1)
    h = jnp.concatenate([b0[:, None], h_tail], axis=1)                 # (bs, l)

    # F^T[j, i] = h[i - j] for i >= j, else 0   (upper-triangular Toeplitz)
    idx = jnp.arange(l)
    d = idx[None, :] - idx[:, None]                                    # d[j, i] = i - j
    ft = jnp.where(d[None, :, :] >= 0,
                   jnp.take(h, jnp.clip(d, 0, l - 1), axis=1), 0.0)    # (bs, l, l)

    # boundary correction rows: y[m] += (A^m)[0, :] @ z_in
    hmat = jnp.transpose(rows, (0, 2, 1))                              # (bs, 2, l)

    # tail-state map: w = sum_j A^{l-1-j} Bv x[j]  ->  gT[j, :] = A^{l-1-j} Bv
    gvec = jnp.einsum('bpij,bj->bpi', P, Bv)                           # (bs, l, 2) = A^p Bv
    gT = gvec[:, ::-1, :]                                              # (bs, l, 2)

    return (ft.astype(jnp.float32), hmat.astype(jnp.float32),
            gT.astype(jnp.float32), An.astype(jnp.float32))


def _block_sosfilt(x2d, ft, hmat, gT, M):
    """x2d: (bs, T) f32  ->  (bs, T) f32."""
    bsz, seq = x2d.shape
    l = L_BLOCK
    nb = -(-seq // l)                                    # total blocks
    nchunks = -(-nb // MAX_BLOCKS_PER_CHUNK)             # chunks first,
    nbc = _round_up(-(-nb // nchunks), 8)                # then blocks/chunk (<=7 pad blocks/chunk)
    nbp = nchunks * nbc
    pad = nbp * l - seq

    x_pad = jnp.pad(x2d, ((0, 0), (0, pad))) if pad else x2d
    x_blocks = x_pad.reshape(bsz, nbp, l)                # contiguous, no transpose

    # Per-block zero-state tail states:  W = X @ G^T    (bs, nbp, 2)
    w = jnp.einsum('bnl,bls->bns', x_blocks, gT)

    # Inter-block state via log-depth affine scan (off the kernel critical path):
    #   c_k = M c_{k-1} + w_k  (inclusive);  z_0 = 0, z_k = c_{k-1}.
    Ms = jnp.broadcast_to(M[:, None, :, :], (bsz, nbp, 2, 2))

    def _combine(a, bb):
        A1, v1 = a
        A2, v2 = bb
        return jnp.matmul(A2, A1), jnp.matmul(A2, v1[..., None])[..., 0] + v2

    _, c = lax.associative_scan(_combine, (Ms, w), axis=1)
    z_blocks = jnp.concatenate(
        [jnp.zeros((bsz, 1, 2), jnp.float32), c[:, :-1, :]], axis=1)   # (bs, nbp, 2)

    y_blocks = _pallas_block_apply(x_blocks, z_blocks, ft, hmat, nbc)
    y = y_blocks.reshape(bsz, nbp * l)
    return y[:, :seq] if pad else y


def lowshelf_forward(
    x,
    control_params,
    sample_rate=44100.0,
    min_gain_db=-12.0,
    max_gain_db=12.0,
    min_cutoff_freq=20.0,
    max_cutoff_freq=2000.0,
    min_q_factor=0.1,
    max_q_factor=10.0,
):
    """control_type='static', train=False forward pass."""
    bs_x, chs_x, seq_len_x = x.shape
    bs_c, chs_c, seq_len_c = control_params.shape
    assert bs_x == bs_c
    assert chs_x == 1
    assert chs_c == 3
    assert seq_len_c == 1

    gain_db = _denormalize(control_params[:, 0, :], min_gain_db, max_gain_db)          # (bs, 1)
    cutoff_freq = _denormalize(control_params[:, 1, :], min_cutoff_freq, max_cutoff_freq)
    q_factor = _denormalize(control_params[:, 2, :], min_q_factor, max_q_factor)
    param_dict = {
        "band0_gain_db": gain_db,
        "band0_cutoff_freq": cutoff_freq,
        "band0_q_factor": q_factor,
    }

    b, a = _biquad_low_shelf(
        gain_db[:, 0], cutoff_freq[:, 0], q_factor[:, 0], sample_rate
    )  # (bs, 3) each; a[:, 0] == 1
    ft, hmat, gT, M = _block_filter_matrices(b, a, L_BLOCK)

    x2d = x[:, 0, :].astype(jnp.float32)                 # (bs, T)
    y2d = _block_sosfilt(x2d, ft, hmat, gT, M)           # (bs, T)
    output = y2d[:, None, :]                             # (bs, 1, T)
    return output, param_dict


# ----------------------------------------------------------------------------
# Pure-JAX reference (sample-serial DF-I lax.scan) for correctness check.
# ----------------------------------------------------------------------------
def _ref_sosfilt(b, a, x):
    """b, a: (bs, 3); x: (bs, T) -> (bs, T)."""
    bs = x.shape[0]
    z = jnp.zeros((bs,), jnp.float32)

    def step(carry, xt):
        x1, x2, y1, y2 = carry
        yt = b[:, 0] * xt + b[:, 1] * x1 + b[:, 2] * x2 - a[:, 1] * y1 - a[:, 2] * y2
        return (xt, x1, yt, y1), yt

    _, ys = lax.scan(step, (z, z, z, z), x.T)
    return ys.T


if __name__ == "__main__":
    key = jax.random.PRNGKey(0)
    k1, k2, k3, k4 = jax.random.split(key, 4)

    run = jax.jit(lowshelf_forward)

    # --- Test 1: bs=2, seq a multiple of the 128-sample block ---
    bs, seq_len = 2, 256
    x = jax.random.normal(k1, (bs, 1, seq_len), dtype=jnp.float32)
    control_params = jax.random.uniform(k2, (bs, 3, 1), dtype=jnp.float32)  # in [0, 1]
    out, param_dict = run(x, control_params)
    out = jax.block_until_ready(out)

    g = param_dict["band0_gain_db"][:, 0]
    fc = param_dict["band0_cutoff_freq"][:, 0]
    q = param_dict["band0_q_factor"][:, 0]
    b_ref, a_ref = _biquad_low_shelf(g, fc, q, 44100.0)
    y_ref = _ref_sosfilt(b_ref, a_ref, x[:, 0, :])
    assert out.shape == (bs, 1, seq_len)
    err1 = float(jnp.max(jnp.abs(out[:, 0, :] - y_ref)))
    assert jnp.allclose(out[:, 0, :], y_ref, atol=2e-3, rtol=2e-3), err1

    # --- Test 2: bs=1, ragged seq (exercises padding policy + megacore-friendly grid) ---
    bs2, seq2 = 1, 1000
    x2 = jax.random.normal(k3, (bs2, 1, seq2), dtype=jnp.float32)
    cp2 = jax.random.uniform(k4, (bs2, 3, 1), dtype=jnp.float32)
    out2, pd2 = run(x2, cp2)
    out2 = jax.block_until_ready(out2)

    b2, a2 = _biquad_low_shelf(pd2["band0_gain_db"][:, 0],
                               pd2["band0_cutoff_freq"][:, 0],
                               pd2["band0_q_factor"][:, 0], 44100.0)
    y2_ref = _ref_sosfilt(b2, a2, x2[:, 0, :])
    assert out2.shape == (bs2, 1, seq2)
    err2 = float(jnp.max(jnp.abs(out2[:, 0, :] - y2_ref)))
    assert jnp.allclose(out2[:, 0, :], y2_ref, atol=2e-3, rtol=2e-3), err2

    print("KERNEL_OK")
</pallas_src>

<mosaic_0001>
module attributes {stable_mosaic.version = 11 : i64} {
  func.func @lowshelf_block_kernel(%arg0: i32, %arg1: i32, %arg2: memref<1x8x128xf32, #tpu.memory_space<vmem>>, %arg3: memref<1x8x2xf32, #tpu.memory_space<vmem>>, %arg4: memref<1x128x128xf32, #tpu.memory_space<vmem>>, %arg5: memref<1x2x128xf32, #tpu.memory_space<vmem>>, %arg6: memref<1x8x128xf32, #tpu.memory_space<vmem>>) attributes {dimension_semantics = [#tpu.dimension_semantics<parallel>, #tpu.dimension_semantics<parallel>], iteration_bounds = array<i64: 2, 1>, scalar_prefetch = 0 : i64, scratch_operands = 0 : i64, tpu.core_type = #tpu.core_type<tc>, window_params = [{transform_indices = @transform_0, window_bounds = array<i64: 1, 8, 128>}, {transform_indices = @transform_1, window_bounds = array<i64: 1, 8, 2>}, {transform_indices = @transform_2, window_bounds = array<i64: 1, 128, 128>}, {transform_indices = @transform_3, window_bounds = array<i64: 1, 2, 128>}, {transform_indices = @transform_4, window_bounds = array<i64: 1, 8, 128>}]} {
    %c0 = arith.constant 0 : index
    %c0_0 = arith.constant 0 : index
    %c0_1 = arith.constant 0 : index
    %0 = vector.load %arg2[%c0, %c0_0, %c0_1] : memref<1x8x128xf32, #tpu.memory_space<vmem>>, vector<1x8x128xf32>
    %1 = vector.shape_cast %0 : vector<1x8x128xf32> to vector<8x128xf32>
    %c0_2 = arith.constant 0 : index
    %c0_3 = arith.constant 0 : index
    %c0_4 = arith.constant 0 : index
    %2 = vector.load %arg4[%c0_2, %c0_3, %c0_4] : memref<1x128x128xf32, #tpu.memory_space<vmem>>, vector<1x128x128xf32>
    %3 = vector.shape_cast %2 : vector<1x128x128xf32> to vector<128x128xf32>
    %cst = arith.constant dense<0.000000e+00> : vector<8x128xf32>
    %4 = tpu.matmul %1, %3, %cst {dimension_numbers = #tpu.dot_dimension_numbers<[1], [0], [0], [1], [0, 0, 1, 1], [], []>} : vector<8x128xf32>, vector<128x128xf32>, vector<8x128xf32> -> vector<8x128xf32>
    %c0_5 = arith.constant 0 : index
    %c0_6 = arith.constant 0 : index
    %c0_7 = arith.constant 0 : index
    %5 = vector.load %arg3[%c0_5, %c0_6, %c0_7] : memref<1x8x2xf32, #tpu.memory_space<vmem>>, vector<1x8x2xf32>
    %6 = vector.shape_cast %5 : vector<1x8x2xf32> to vector<8x2xf32>
    %7 = vector.extract_strided_slice %6 {offsets = [0, 0], sizes = [8, 1], strides = [1, 1]} : vector<8x2xf32> to vector<8x1xf32>
    %c0_8 = arith.constant 0 : index
    %c0_9 = arith.constant 0 : index
    %c0_10 = arith.constant 0 : index
    %8 = vector.load %arg5[%c0_8, %c0_9, %c0_10] : memref<1x2x128xf32, #tpu.memory_space<vmem>>, vector<1x1x128xf32>
    %9 = vector.shape_cast %8 : vector<1x1x128xf32> to vector<1x128xf32>
    %10 = vector.broadcast %7 : vector<8x1xf32> to vector<8x128xf32>
    %11 = vector.broadcast %9 : vector<1x128xf32> to vector<8x128xf32>
    %12 = arith.mulf %10, %11 : vector<8x128xf32>
    %13 = arith.addf %4, %12 : vector<8x128xf32>
    %14 = vector.extract_strided_slice %6 {offsets = [0, 1], sizes = [8, 1], strides = [1, 1]} : vector<8x2xf32> to vector<8x1xf32>
    %c0_11 = arith.constant 0 : index
    %c1 = arith.constant 1 : index
    %c0_12 = arith.constant 0 : index
    %15 = vector.load %arg5[%c0_11, %c1, %c0_12] : memref<1x2x128xf32, #tpu.memory_space<vmem>>, vector<1x1x128xf32>
    %16 = vector.shape_cast %15 : vector<1x1x128xf32> to vector<1x128xf32>
    %17 = vector.broadcast %14 : vector<8x1xf32> to vector<8x128xf32>
    %18 = vector.broadcast %16 : vector<1x128xf32> to vector<8x128xf32>
    %19 = arith.mulf %17, %18 : vector<8x128xf32>
    %20 = arith.addf %13, %19 : vector<8x128xf32>
    %c0_13 = arith.constant 0 : index
    %c0_14 = arith.constant 0 : index
    %c0_15 = arith.constant 0 : index
    %21 = vector.load %arg6[%c0_13, %c0_14, %c0_15] : memref<1x8x128xf32, #tpu.memory_space<vmem>>, vector<1x8x128xf32>
    %22 = vector.shape_cast %21 : vector<1x8x128xf32> to vector<8x128xf32>
    %23 = vector.shape_cast %20 : vector<8x128xf32> to vector<1x8x128xf32>
    tpu.vector_store %arg6[%c0_13, %c0_14, %c0_15], %23 {strides = array<i32>} : memref<1x8x128xf32, #tpu.memory_space<vmem>>, vector<1x8x128xf32>,
    return
  }
  func.func @transform_0(%arg0: i32, %arg1: i32) -> (i32, i32, i32) {
    %c0_i32 = arith.constant 0 : i32
    %c0_i32_0 = arith.constant 0 : i32
    return %arg0, %arg1, %c0_i32 : i32, i32, i32
  }
  func.func @transform_1(%arg0: i32, %arg1: i32) -> (i32, i32, i32) {
    %c0_i32 = arith.constant 0 : i32
    %c0_i32_0 = arith.constant 0 : i32
    return %arg0, %arg1, %c0_i32 : i32, i32, i32
  }
  func.func @transform_2(%arg0: i32, %arg1: i32) -> (i32, i32, i32) {
    %c0_i32 = arith.constant 0 : i32
    %c0_i32_0 = arith.constant 0 : i32
    %c0_i32_1 = arith.constant 0 : i32
    return %arg0, %c0_i32, %c0_i32_0 : i32, i32, i32
  }
  func.func @transform_3(%arg0: i32, %arg1: i32) -> (i32, i32, i32) {
    %c0_i32 = arith.constant 0 : i32
    %c0_i32_0 = arith.constant 0 : i32
    %c0_i32_1 = arith.constant 0 : i32
    return %arg0, %c0_i32, %c0_i32_0 : i32, i32, i32
  }
  func.func @transform_4(%arg0: i32, %arg1: i32) -> (i32, i32, i32) {
    %c0_i32 = arith.constant 0 : i32
    %c0_i32_0 = arith.constant 0 : i32
    return %arg0, %arg1, %c0_i32 : i32, i32, i32
  }
}

</mosaic_0001>

<bundles_post_ra>
// kernel: lowshelf_forward.1
= control target key start
LH: loop header
LB: loop body
LE: loop exit
PB: predicated region body
PF: predicated region fallthrough
CT: control target
= control target key end

     0   :  { %s690_s15 = smov 0   ;;  %s692_s16 = smov 0   ;;  %s760_s0 = inlined_call_operand.vmem [shape: f32[2,8,128], index: 0, kind: input, shape index: {}]   ;;  %s761_s1 = inlined_call_operand.vmem [shape: f32[2,8,2], index: 1, kind: input, shape index: {}]   ;;  %s762_s2 = inlined_call_operand.vmem [shape: f32[2,128,128], index: 2, kind: input, shape index: {}]   ;;  %s763_s3 = inlined_call_operand.vmem [shape: f32[2,2,128], index: 3, kind: input, shape index: {}]   ;;  %s764_s4 = inlined_call_operand.vmem [shape: f32[2,8,128], index: 4, kind: output, shape index: {}]  }
   0x1   :  { %s694_s17 = smov 0  }
   0x2 LB: > { %s26_s18 = sadd.s32 1, %s654_s16  ;;  %p517_p0 = scmp.ge.s32.totalorder %s658_s17, 1  ;;  %s658_s17 = sphi %s694_s17, %s14_s17   ;;  %s654_s16 = sphi %s692_s16, %s766_s16   ;;  %s650_s15 = sphi %s690_s15, %s765_s15  }
   0x3   : > { %p28_p1 = scmp.ge.s32.totalorder %s26_s18, 2  ;;  %p213_p2 = scmp.lt.s32.totalorder %s658_s17, 3 }
   0x5   : > { %s768_s18 = smov (%p28_p1, %s26_s18), 0  ;;  %p214_p3 = pnand %p517_p0, %p213_p2 }
   0x6   : > { %p259_p4 = scmp.lt.s32.totalorder (!%p214_p3), %s650_s15, 1  ;;  %v660_v0 = vmov (!%p214_p3), 0.0|0.0   ;;  %vm661_vm0 = vmmov (!%p214_p3), 0   ;;  %v662_v1 = vmov (!%p214_p3), 0.0   ;;  %v663_v2 = vmov (!%p214_p3), 0  }
   0x7   : > { %217 = sbr.rel (%p214_p3) target bundleno = 268 (0x10c), region = 36  ;;  %581 = vmatprep.subr.bf16.mxu0 (!%p214_p3), %v660_v0  ;;  %578 = vmatprep.mubr.msk.f32.mxu0 (!%p214_p3), %vm661_vm0, %v662_v1  ;;  %v664_v15 = vmov (!%p214_p3), 1  }
   0x8   : > { %634 = vset.pattern.permute.xlu0 (!%p214_p3), %v663_v2 }
   0xe   : > { %s770_s15 = smov (!%p259_p4, %s650_s15), 1 }
   0xf   : > { %s528_s19 = sshll.u32 %s770_s15, 7  ;;  %s721_s23 = sshll.u32 %s770_s15, 3 }
  0x10   : > { %s714_s22 = scalar_lea.vmem %s762_s2, %s528_s19  ;;  %s272_s26 = scalar_lea.vmem %s761_s1, %s721_s23 }
  0x11   : > { %v290_v3 = vld [vmem:[%s714_s22] sm:$0xff]  ;;  %v291_v4 = vld [vmem:[%s714_s22 + $0x8] sm:$0xff]  ;;  %v292_v5 = vld [vmem:[%s714_s22 + $0x10] sm:$0xff]  ;;  %s265_s29 = scalar_lea.vmem %s760_s0, %s721_s23  ;;  %s522_s30 = sshll.u32 %s770_s15, 1 }
  0x12   : > { %v582_v6 = vpack.c.bf16 %v291_v4, %v290_v3  ;;  %v293_v7 = vld [vmem:[%s714_s22 + $0x18] sm:$0xff]  ;;  %v294_v9 = vld [vmem:[%s714_s22 + $0x20] sm:$0xff]  ;;  %v295_v10 = vld [vmem:[%s714_s22 + $0x28] sm:$0xff]  ;;  %s281_s7 = scalar_lea.vmem %s763_s3, %s522_s30  ;;  %s288_s10 = scalar_lea.vmem %s764_s4, %s721_s23 }
  0x13   : > { %v585_v8 = vpack.c.bf16 %v293_v7, %v292_v5  ;;  %v306_v11 = vld [vmem:[%s272_s26] sm:$0xff]  ;;  %v588_v12 = vpack.c.bf16 %v295_v10, %v294_v9  ;;  %v296_v13 = vld [vmem:[%s714_s22 + $0x30] sm:$0xff]  ;;  %v297_v14 = vld [vmem:[%s714_s22 + $0x38] sm:$0xff] }
  0x14   : > { %583 = vmatpush3.bf16.msra.mxu0 %v582_v6  ;;  %310 = vperm.xlu0 %634, %v306_v11   ;;  %v591_v16 = vpack.c.bf16 %v297_v14, %v296_v13  ;;  %v298_v17 = vld [vmem:[%s714_s22 + $0x40] sm:$0xff]  ;;  %v299_v18 = vld [vmem:[%s714_s22 + $0x48] sm:$0xff]  ;;  %v300_v20 = vld [vmem:[%s714_s22 + $0x50] sm:$0xff] }
  0x15   : > { %584 = vmatprep.subr.bf16.mxu0 %v660_v0  ;;  %v594_v19 = vpack.c.bf16 %v299_v18, %v298_v17  ;;  %v301_v21 = vld [vmem:[%s714_s22 + $0x58] sm:$0xff]  ;;  %v302_v23 = vld [vmem:[%s714_s22 + $0x60] sm:$0xff]  ;;  %v303_v24 = vld [vmem:[%s714_s22 + $0x68] sm:$0xff] }
  0x16   : > { %v597_v22 = vpack.c.bf16 %v301_v21, %v300_v20  ;;  %v600_v25 = vpack.c.bf16 %v303_v24, %v302_v23  ;;  %v304_v26 = vld [vmem:[%s714_s22 + $0x70] sm:$0xff]  ;;  %v305_v27 = vld [vmem:[%s714_s22 + $0x78] sm:$0xff]  ;;  %v289_v29 = vld [vmem:[%s265_s29] sm:$0xff] }
  0x17   : > { %v603_v28 = vpack.c.bf16 %v305_v27, %v304_v26  ;;  %v524_v31 = vld [vmem:[%s281_s7] ss:$0 sm:$0xff]  ;;  %v525_v32 = vld [vmem:[%s281_s7 + $0x1] ss:$0 sm:$0xff] }
  0x18   : > { %586 = vmatpush3.bf16.msra.mxu0 %v585_v8  ;;  %635 = vset.pattern.permute.xlu0 %v664_v15 }
  0x19   : > { %587 = vmatprep.subr.bf16.mxu0 %v660_v0  ;;  %390 = vperm.xlu0 %635, %v306_v11  }
  0x1c   : > { %589 = vmatpush3.bf16.msra.mxu0 %v588_v12 }
  0x1d   : > { %590 = vmatprep.subr.bf16.mxu0 %v660_v0 }
  0x20   : > { %592 = vmatpush3.bf16.msra.mxu0 %v591_v16 }
  0x21   : > { %593 = vmatprep.subr.bf16.mxu0 %v660_v0 }
  0x24   : > { %595 = vmatpush3.bf16.msra.mxu0 %v594_v19 }
  0x25   : > { %596 = vmatprep.subr.bf16.mxu0 %v660_v0 }
  0x28   : > { %598 = vmatpush3.bf16.msra.mxu0 %v597_v22 }
  0x29   : > { %599 = vmatprep.subr.bf16.mxu0 %v660_v0 }
  0x2c   : > { %601 = vmatpush3.bf16.msra.mxu0 %v600_v25 }
  0x2d   : > { %602 = vmatprep.subr.bf16.mxu0 %v660_v0 }
  0x30   : > { %604 = vmatpush3.bf16.msra.mxu0 %v603_v28 }
  0x33   : > { %579 = vmatmul.mubr.f32.vlgmr.msra.gmra.mrb[0].mxu0 %v289_v29 }
  0x93   : > { %v311_v30 = vpop.permute.xlu0 %310 }
  0x94   : > { %v317_v34 = vmul.f32 %v524_v31, %v311_v30 }
  0x98   : > { %v391_v33 = vpop.permute.xlu0 %390 }
  0x99   : > { %v397_v35 = vmul.f32 %v525_v32, %v391_v33 }
 0x106   : > { %v384_v36 = vpop.f32.mrb[0].mxu0 }
 0x107   : > { %v385_v37 = vadd.f32 %v384_v36, %v317_v34  ;;  %v580_v38 = vpop.f32.mrb[1].mxu0 }
 0x109   : > { %v398_v39 = vadd.f32 %v397_v35, %v385_v37 }
 0x10b   : > { %399 = vst [vmem:[%s288_s10] sm:$0xff] %v398_v39 }
 0x10c PF: > { %s14_s17 = sadd.s32 1, %s658_s17   ;;  %s765_s15 = smov %s654_s16 }
 0x10d   : > { %p11_p5 = scmp.ge.s32.totalorder %s14_s17, 4   ;;  %s766_s16 = smov %s768_s18 }
 0x10f   :  { %13 = sbr.rel (!%p11_p5) target bundleno = 2 (0x2), region = 75 }

</bundles_post_ra>
